<compile_context>
chip_gen: v5e
topology: v5e:2x2
jax: 0.10.0
libtpu: 0.0.40
codegen_flags: <defaults>
</compile_context>

<pallas_src>
import jax
import jax.numpy as jnp
from jax.experimental import pallas as pl
from jax.experimental.pallas import tpu as pltpu


def _normalize_kernel(img_ref, scale_ref, bias_ref, out_ref):
    # img_ref:   (Rt, HWt)   rows = flattened (batch*channel), lanes = spatial
    # scale_ref: (Rt, 1)     1/std        (per row)
    # bias_ref:  (Rt, 1)     -mean/std    (per row)
    # out_ref:   (Rt, HWt)
    out_ref[...] = (img_ref[...] * scale_ref[...] + bias_ref[...]).astype(out_ref.dtype)


def _round_up(x, m):
    return -(-x // m) * m


def _choose_tiles(R, HW, itemsize, target_bytes):
    """Pick (row_tile, hw_tile) with padding-aware VMEM accounting.

    R  = B*C flattened row extent, HW = H*W flattened spatial (lane) extent.
    """
    sub = max(8, 32 // itemsize)   # sublane packing multiple: 8 f32, 16 bf16, 32 i8
    lane = 128

    # --- spatial (lane) tile: balanced multiples of 128 ----------------------
    # Largest lane width such that one sublane-group (sub rows) fits the target.
    max_lane = max(lane, (target_bytes // (sub * itemsize)) // lane * lane)
    if HW <= max_lane:
        hw_tile = HW                       # full lane extent: one contiguous DMA
    else:
        n = -(-HW // max_lane)
        while True:
            hw_tile = _round_up(-(-HW // n), lane)
            if hw_tile <= max_lane or hw_tile == lane:
                break
            n += 1

    # --- row tile: fill the target with fully-occupied (sub,128) tiles -------
    bytes_per_row_group = sub * _round_up(hw_tile, lane) * itemsize
    n_groups = max(1, target_bytes // bytes_per_row_group)
    row_tile = min(R, n_groups * sub)      # multiple of sub, or the full extent

    # --- megacore: guarantee >= 2 grid steps so v7x's 2nd TC gets work -------
    n_rows = -(-R // row_tile)
    n_sp = -(-HW // hw_tile)
    if n_rows * n_sp < 2:
        if R >= 2 * sub:
            row_tile = _round_up(-(-R // 2), sub)      # split rows in ~half
        elif HW > lane:
            hw_tile = _round_up(-(-HW // 2), lane)     # else split spatially
        # otherwise the whole problem is a single tiny tile — leave it.
    return row_tile, hw_tile


def aug_pipe_forward(batch, mean, std, *, tile_bytes=8 << 20, in_place=False):
    """Apply AugPipe(Normalize(mean, std), batch_size) to `batch`.

    batch['image'] : (B, 1, C, H, W)
    batch['labels']: passed through unchanged
    batch['boxes'] : passed through unchanged
    batch['masks'] : (optional) passed through unchanged
    Returns a new dict with image of shape (B, C, H, W).
    """
    image = batch["image"]
    B, one, C, H, W = image.shape
    assert one == 1, "expected 'b () c h w' layout"
    HW = H * W
    R = B * C

    # 'b () c h w -> (b c) (h w)': contiguous reshape, no data movement.
    img2d = image.reshape(R, HW)

    # Per-row (batch*channel) affine params, built once in the wrapper.
    scale = jnp.tile((1.0 / std).astype(jnp.float32), B).reshape(R, 1)
    bias = jnp.tile((-mean / std).astype(jnp.float32), B).reshape(R, 1)

    itemsize = jnp.dtype(image.dtype).itemsize
    row_tile, hw_tile = _choose_tiles(R, HW, itemsize, tile_bytes)
    grid = (pl.cdiv(R, row_tile), pl.cdiv(HW, hw_tile))

    out = pl.pallas_call(
        _normalize_kernel,
        out_shape=jax.ShapeDtypeStruct((R, HW), image.dtype),
        grid_spec=pltpu.PrefetchScalarGridSpec(
            num_scalar_prefetch=0,
            grid=grid,
            in_specs=[
                # (Rt, HWt) slab: rows fully pack (8,128) tiles, lanes are a
                # multiple of 128 or the full extent.
                pl.BlockSpec((row_tile, hw_tile), lambda r, s: (r, s)),
                # scale / bias: tiny (Rt, 1) column per row-block.
                pl.BlockSpec((row_tile, 1), lambda r, s: (r, 0)),
                pl.BlockSpec((row_tile, 1), lambda r, s: (r, 0)),
            ],
            out_specs=pl.BlockSpec((row_tile, hw_tile), lambda r, s: (r, s)),
        ),
        compiler_params=pltpu.CompilerParams(
            # Pure elementwise: both grid axes are independent.
            dimension_semantics=("parallel", "parallel"),
            # ~4 x 8 MiB double-buffered pipeline (padding-aware) fits easily;
            # safe on v5e/v6e (128 MiB) and v7x (64 MiB physical).
            vmem_limit_bytes=48 << 20,
        ),
        # Opt-in in-place normalize: same bytes moved, half the HBM footprint.
        input_output_aliases={0: 0} if in_place else {},
    )(img2d, scale, bias)

    result = dict(batch)
    result["image"] = out.reshape(B, C, H, W)  # 'b () c h w -> b c h w'
    # labels / boxes / masks untouched by Normalize -> pass through unchanged.
    return result


def _reference(image, mean, std):
    B, _, C, H, W = image.shape
    img = image[:, 0].astype(jnp.float32)
    return (img - mean.reshape(1, C, 1, 1)) / std.reshape(1, C, 1, 1)


if __name__ == "__main__":
    key = jax.random.PRNGKey(0)
    k_img, k_boxes, k_img2, k_img3, k_img4 = jax.random.split(key, 5)

    B, C = 2, 4
    N_BOXES = 3

    # Deterministic "augmentation parameters" (per-channel normalize stats).
    mean = jnp.array([0.1, 0.2, 0.3, 0.4], dtype=jnp.float32)
    std = jnp.array([0.5, 1.0, 1.5, 2.0], dtype=jnp.float32)

    labels = jnp.arange(B * N_BOXES, dtype=jnp.int32).reshape(B, N_BOXES)

    # --- Case 1: small image, whole-sample lane-dense blocks -----------------
    H = W = 16
    image = jax.random.normal(k_img, (B, 1, C, H, W), dtype=jnp.float32) * 2.0 + 0.5
    boxes = jax.random.uniform(k_boxes, (B, N_BOXES, 4), dtype=jnp.float32) * W
    masks = jnp.zeros((B, N_BOXES, H, W), dtype=jnp.uint8)
    batch = {"image": image, "labels": labels, "boxes": boxes, "masks": masks}

    out_batch = aug_pipe_forward(batch, mean, std)
    jax.block_until_ready(out_batch["image"])
    assert out_batch["image"].shape == (B, C, H, W)
    assert jnp.allclose(out_batch["image"], _reference(image, mean, std),
                        atol=1e-5, rtol=1e-5)
    assert out_batch["labels"] is labels
    assert out_batch["boxes"] is boxes
    assert out_batch["masks"] is masks

    # --- Case 2: exercises the evenly-tiled spatial path ----------------------
    H = W = 32
    image2 = jax.random.normal(k_img2, (B, 1, C, H, W), dtype=jnp.float32)
    batch2 = {"image": image2, "labels": labels, "boxes": boxes}
    out2 = aug_pipe_forward(batch2, mean, std, tile_bytes=4096)
    jax.block_until_ready(out2["image"])
    assert out2["image"].shape == (B, C, H, W)
    assert jnp.allclose(out2["image"], _reference(image2, mean, std),
                        atol=1e-5, rtol=1e-5)

    # --- Case 3: exercises a partial (masked) last spatial block --------------
    H = W = 24
    image3 = jax.random.normal(k_img3, (B, 1, C, H, W), dtype=jnp.float32)
    batch3 = {"image": image3, "labels": labels, "boxes": boxes}
    out3 = aug_pipe_forward(batch3, mean, std, tile_bytes=8192)
    jax.block_until_ready(out3["image"])
    assert out3["image"].shape == (B, C, H, W)
    assert jnp.allclose(out3["image"], _reference(image3, mean, std),
                        atol=1e-5, rtol=1e-5)

    # --- Case 4: bf16 input — exercises the .astype(out_ref.dtype) store ------
    H = W = 16
    image4 = (jax.random.normal(k_img4, (B, 1, C, H, W), dtype=jnp.float32)
              ).astype(jnp.bfloat16)
    batch4 = {"image": image4, "labels": labels, "boxes": boxes}
    out4 = aug_pipe_forward(batch4, mean, std)
    jax.block_until_ready(out4["image"])
    assert out4["image"].dtype == jnp.bfloat16
    assert jnp.allclose(out4["image"].astype(jnp.float32),
                        _reference(image4, mean, std), atol=5e-2, rtol=5e-2)

    print("KERNEL_OK")
</pallas_src>

<mosaic_0001>
module attributes {stable_mosaic.version = 11 : i64} {
  func.func @_normalize_kernel(%arg0: i32, %arg1: i32, %arg2: memref<8x128xf32, #tpu.memory_space<vmem>>, %arg3: memref<8x1xf32, #tpu.memory_space<vmem>>, %arg4: memref<8x1xf32, #tpu.memory_space<vmem>>, %arg5: memref<8x128xf32, #tpu.memory_space<vmem>>) attributes {dimension_semantics = [#tpu.dimension_semantics<parallel>, #tpu.dimension_semantics<parallel>], iteration_bounds = array<i64: 1, 2>, scalar_prefetch = 0 : i64, scratch_operands = 0 : i64, tpu.core_type = #tpu.core_type<tc>, window_params = [{transform_indices = @transform_0, window_bounds = array<i64: 8, 128>}, {transform_indices = @transform_1, window_bounds = array<i64: 8, 1>}, {transform_indices = @transform_2, window_bounds = array<i64: 8, 1>}, {transform_indices = @transform_3, window_bounds = array<i64: 8, 128>}]} {
    %c0 = arith.constant 0 : index
    %c0_0 = arith.constant 0 : index
    %0 = vector.load %arg2[%c0, %c0_0] : memref<8x128xf32, #tpu.memory_space<vmem>>, vector<8x128xf32>
    %c0_1 = arith.constant 0 : index
    %c0_2 = arith.constant 0 : index
    %1 = vector.load %arg3[%c0_1, %c0_2] : memref<8x1xf32, #tpu.memory_space<vmem>>, vector<8x1xf32>
    %2 = vector.broadcast %1 : vector<8x1xf32> to vector<8x128xf32>
    %3 = arith.mulf %0, %2 : vector<8x128xf32>
    %c0_3 = arith.constant 0 : index
    %c0_4 = arith.constant 0 : index
    %4 = vector.load %arg4[%c0_3, %c0_4] : memref<8x1xf32, #tpu.memory_space<vmem>>, vector<8x1xf32>
    %5 = vector.broadcast %4 : vector<8x1xf32> to vector<8x128xf32>
    %6 = arith.addf %3, %5 : vector<8x128xf32>
    %c0_5 = arith.constant 0 : index
    %c0_6 = arith.constant 0 : index
    %7 = vector.load %arg5[%c0_5, %c0_6] : memref<8x128xf32, #tpu.memory_space<vmem>>, vector<8x128xf32>
    tpu.vector_store %arg5[%c0_5, %c0_6], %6 {strides = array<i32>} : memref<8x128xf32, #tpu.memory_space<vmem>>, vector<8x128xf32>,
    return
  }
  func.func @transform_0(%arg0: i32, %arg1: i32) -> (i32, i32) {
    %c0_i32 = arith.constant 0 : i32
    return %arg0, %arg1 : i32, i32
  }
  func.func @transform_1(%arg0: i32, %arg1: i32) -> (i32, i32) {
    %c0_i32 = arith.constant 0 : i32
    %c0_i32_0 = arith.constant 0 : i32
    return %arg0, %c0_i32 : i32, i32
  }
  func.func @transform_2(%arg0: i32, %arg1: i32) -> (i32, i32) {
    %c0_i32 = arith.constant 0 : i32
    %c0_i32_0 = arith.constant 0 : i32
    return %arg0, %c0_i32 : i32, i32
  }
  func.func @transform_3(%arg0: i32, %arg1: i32) -> (i32, i32) {
    %c0_i32 = arith.constant 0 : i32
    return %arg0, %arg1 : i32, i32
  }
}

</mosaic_0001>

<bundles_post_ra>
// kernel: tpu_custom_call.1
= control target key start
LH: loop header
LB: loop body
LE: loop exit
PB: predicated region body
PF: predicated region fallthrough
CT: control target
= control target key end

     0   :  { %8 = vsyncpa [#allocation3], 0  ;;  %s641_s0 = inlined_call_operand.vmem [shape: f32[8,256], index: 0, kind: input, shape index: {}]   ;;  %s642_s1 = inlined_call_operand.vmem [shape: f32[8,1], index: 1, kind: input, shape index: {}]   ;;  %s643_s2 = inlined_call_operand.vmem [shape: f32[8,1], index: 2, kind: input, shape index: {}]   ;;  %s644_s3 = inlined_call_operand.hbm [shape: f32[8,256], index: 3, kind: output, shape index: {}]  }
   0x1   :  { %10 = vsyncpa [#allocation3 + $0x1], 0  ;;  %s538_s12 = smov 0   ;;  %s540_s13 = smov 0  }
   0x2   :  { %s542_s14 = smov 0   ;;  %s544_s15 = smov 0  }
   0x3   :  { %s546_s16 = smov 0   ;;  %s548_s17 = smov 0  }
   0x4 LB: > { %s367_s18 = sadd.s32 4294967295, %s515_s17   ;;  %s368_s19 = sadd.s32 4294967294, %s515_s17   ;;  %s515_s17 = sphi %s548_s17, %s16_s17   ;;  %s511_s16 = sphi %s546_s16, %s651_s16   ;;  %s507_s15 = sphi %s544_s15, %s650_s15   ;;  %s503_s14 = sphi %s542_s14, %s649_s14   ;;  %s499_s13 = sphi %s540_s13, %s648_s13   ;;  %s495_s12 = sphi %s538_s12, %s647_s12  }
   0x5   : > { %s25_s20 = sadd.s32 1, %s511_s16  ;;  %s117_s21 = sadd.s32 1, %s503_s14 }
   0x6   : > { %p26_p0 = scmp.ge.s32.totalorder %s25_s20, 2  ;;  %p127_p1 = scmp.ne.s32.totalorder %s503_s14, %s499_s13 }
   0x7   : > { %p128_p2 = scmp.eq.s32.totalorder %s367_s18, 1  ;;  %p133_p3 = scmp.ne.s32.totalorder %s499_s13, %s495_s12 }
   0x8   : > { %s653_s20 = smov (%p26_p0, %s25_s20), 0  ;;  %p134_p5 = scmp.eq.s32.totalorder %s368_s19, 1 }
   0x9   : > { %p578_p4 = por %p128_p2, %p127_p1  ;;  %s113_s23 = ssub.s32 %s511_s16, %s653_s20 }
   0xa   : > { %p373_p6 = scmp.ge.s32.totalorder %s515_s17, 1  ;;  %p115_p7 = scmp.eq.s32.totalorder %s113_s23, 0 }
   0xb   : > { %p585_p8 = por %p134_p5, %p133_p3  ;;  %p177_p9 = scmp.lt.s32.totalorder %s515_s17, 3 }
   0xc   : > { %s591_s25 = scalar_select %p115_p7, %s503_s14, %s117_s21  }
   0xd   : > { %p178_p10 = pnand %p373_p6, %p177_p9 }
   0xe   : > { %p214_p11 = scmp.lt.s32.totalorder (!%p178_p10), %s507_s15, 1  ;;  %s209_s4 = sand.u32 (!%p178_p10), 1, %s499_s13  }
   0xf   : > { %181 = sbr.rel (%p178_p10) target bundleno = 150 (0x96), region = 32  ;;  %s374_s6 = sshll.u32 (!%p178_p10), %s209_s4, 3 }
  0x10   : > { %s377_s7 = sshll.u32 (!%p178_p10), %s507_s15, 3  ;;  %s211_s21 = scalar_lea.vmem (!%p178_p10), [#allocation2], %s374_s6 }
  0x11   : > { %s257_s19 = scalar_lea.hbm (!%p178_p10), %s644_s3, %s377_s7  ;;  %s259_s23 = sshll.u32 (!%p178_p10), %s211_s21, 4  ;;  %s260_s23 = int_to_ptr.vmem [resolvable:$true] %s259_s23 }
  0x12   : > { %s261_s26 = sshll.u32 (!%p178_p10), %s257_s19, 4  ;;  %s262_s26 = int_to_ptr.hbm [resolvable:$true] %s261_s26 }
  0x13   : > { %s451_s27 = sshra.s32 (!%p178_p10), %s262_s26, 4  ;;  %s452_s27 = int_to_ptr.hbm [resolvable:$true] %s451_s27 }
  0x14   : > { %v229_v0 = vld [vmem:[%s642_s1] sm:$0xff]  ;;  %v517_v1 = vmov 0   ;;  %s215_s30 = scalar_select %p214_p11, %s507_s15, 1 }
  0x15   : > { %436 = vset.pattern.permute.xlu0 %v517_v1  ;;  %v236_v2 = vld [vmem:[%s643_s2] sm:$0xff]  ;;  %s245_s15 = scalar_lea.sflag [#allocation3], %s209_s4  ;;  %s453_s28 = scalar_lea.hbm %s452_s27, 8 }
  0x16   : > { %232 = vperm.xlu0 %436, %v229_v0   ;;  %s375_s5 = sshll.u32 %s215_s30, 3  ;;  %p454_p12 = scmp.ne.s32.totalorder %s452_s27, %s453_s28 }
  0x17   : > { %s219_s10 = scalar_lea.vmem %s641_s0, %s375_s5  ;;  %s457_s5 = scalar_lea.hbm %s644_s3, 16 }
  0x18   : > { %v228_v4 = vld [vmem:[%s219_s10] sm:$0xff]  ;;  %p455_p13 = pnand %p454_p12, %p578_p4  ;;  %p458_p1 = scmp.lt.s32.totalorder %s452_s27, %s644_s3 }
  0x19   : > { %p459_p2 = scmp.lt.s32.totalorder %s457_s5, %s453_s28 }
  0x1a   : > { %p456_p0 = pneg %p455_p13 }
  0x1b   : > { %p460_p3 = por %p459_p2, %p458_p1 }
  0x1d   : > { %p461_p5 = pnand %p460_p3, %p456_p0 }
  0x1e   : > { %239 = vperm.xlu0 %436, %v236_v2  }
  0x88   : > { %v233_v3 = vpop.permute.xlu0 %232 }
  0x89   : > { %v235_v5 = vmul.f32 %v233_v3, %v228_v4 }
  0x90   : > { %v240_v6 = vpop.permute.xlu0 %239 }
  0x91   : > { %v242_v7 = vadd.f32 %v240_v6, %v235_v5 }
  0x93   : > { %243 = vst [vmem:[%s211_s21] sm:$0xff] %v242_v7 }
  0x94   : > { %464 = shalt.err (!%p461_p5)
}
  0x95   : > { %380 = dma.vmem_to_hbm [thread:$0]  (%p578_p4), %s260_s23, 128, %s262_s26, %s245_s15  }
  0x96 PF: > { %p386_p6 = scmp.ge.s32.totalorder %s515_s17, 2  ;;  %s273_s4 = sand.u32 1, %s495_s12  }
  0x97   : > { %s274_s8 = scalar_lea.sflag [#allocation3], %s273_s4 }
  0x98   : > { %p383_p7 = pnand %p386_p6, %p585_p8 }
  0x9a   : > { %p384_p9 = pneg %p383_p7 }
  0x9c   : > { %490 = dma.done.wait (%p384_p9), %s274_s8, 128  }
  0x9d   : > { %492 = vsyncadd (%p384_p9), %s274_s8, 4294967168  ;;  %s16_s17 = sadd.s32 1, %s515_s17   ;;  %s647_s12 = smov %s499_s13 }
  0x9e   : > { %p13_p10 = scmp.ge.s32.totalorder %s16_s17, 4   ;;  %s648_s13 = smov %s503_s14 }
  0x9f   : > { %s649_s14 = smov %s591_s25  ;;  %s650_s15 = smov %s511_s16 }
  0xa0   : > { %s651_s16 = smov %s653_s20  ;;  %15 = sbr.rel (!%p13_p10) target bundleno = 4 (0x4), region = 73 }
  0xa5   :  { %280 = vsyncpa [#allocation3], 1 }
  0xa6   :  { %282 = vsyncpa [#allocation3 + $0x1], 1 }

</bundles_post_ra>
